<compile_context>
chip_gen: v7x
topology: tpu7x:2x2x1
jax: 0.10.0
libtpu: 0.0.40
codegen_flags: <defaults>
</compile_context>

<pallas_src>
import functools

import jax
import jax.numpy as jnp
from jax import lax
from jax.experimental import pallas as pl
from jax.experimental.pallas import tpu as pltpu


_VMEM_BUDGET = 48 * 1024 * 1024  # conservative: fits v7x's 64 MiB/TC with headroom


def _round_up(x: int, m: int) -> int:
    return ((x + m - 1) // m) * m


def _sublane(dtype) -> int:
    # Minimum sublane multiple for the dtype's packing (f32:8, bf16:16, int8/fp8:32).
    itemsize = jnp.dtype(dtype).itemsize
    return max(8, 32 // itemsize)


def _gelu_exact(h):
    # Exact erf-based GELU in f32 (matches the PyTorch module's GELU).
    inv_sqrt2 = jnp.float32(0.7071067811865476)
    return h * 0.5 * (1.0 + lax.erf(h * inv_sqrt2))


# ---------------------------------------------------------------------------
# Kernels
# ---------------------------------------------------------------------------
def _ffn_kernel_resident(x_ref, w1t_ref, w2t_ref, o_ref):
    # x_ref   : (tm, d_model)        row tile of tokens (native dtype)
    # w1t_ref : (d_model, dff_pad)   full W1^T, VMEM-resident (constant index_map)
    # w2t_ref : (dff_pad, d_model)   full W2^T, VMEM-resident (constant index_map)
    # o_ref   : (tm, d_model)
    h = jnp.dot(x_ref[...], w1t_ref[...], preferred_element_type=jnp.float32)
    g = _gelu_exact(h)
    o_ref[...] = jnp.dot(
        g.astype(w2t_ref.dtype), w2t_ref[...], preferred_element_type=jnp.float32
    ).astype(o_ref.dtype)


def _ffn_kernel_tiled(x_ref, w1t_ref, w2t_ref, o_ref, acc_ref):
    # Same as above, but d_ff is tiled along grid axis 1 with an f32 accumulator.
    j = pl.program_id(1)

    @pl.when(j == 0)
    def _():
        acc_ref[...] = jnp.zeros_like(acc_ref)

    h = jnp.dot(x_ref[...], w1t_ref[...], preferred_element_type=jnp.float32)
    g = _gelu_exact(h)
    acc_ref[...] += jnp.dot(
        g.astype(w2t_ref.dtype), w2t_ref[...], preferred_element_type=jnp.float32
    )

    @pl.when(j == pl.num_programs(1) - 1)
    def _():
        o_ref[...] = acc_ref[...].astype(o_ref.dtype)


# ---------------------------------------------------------------------------
# VMEM working-set estimates (double-buffered pipelined operands)
# ---------------------------------------------------------------------------
def _resident_vmem_bytes(tm, d_model, dff_pad, in_isz, w_isz, out_isz):
    x_buf = 2 * tm * d_model * in_isz
    w_buf = 2 * 2 * d_model * dff_pad * w_isz  # both weights (double-buffered alloc)
    o_buf = 2 * tm * d_model * out_isz
    inter = 2 * tm * dff_pad * 4               # f32 h / GELU intermediates
    return x_buf + w_buf + o_buf + inter


def _tiled_vmem_bytes(tm, tf, d_model, in_isz, w_isz, out_isz):
    x_buf = 2 * tm * d_model * in_isz
    w_buf = 2 * 2 * d_model * tf * w_isz
    o_buf = 2 * tm * d_model * out_isz
    acc = tm * d_model * 4
    inter = 2 * tm * tf * 4
    return x_buf + w_buf + o_buf + acc + inter


# ---------------------------------------------------------------------------
# Wrapper
# ---------------------------------------------------------------------------
@functools.partial(
    jax.jit, static_argnames=("tm", "tf", "cast_to_bf16", "force_tiled")
)
def positionwise_feedforward(x, w1, w2, *, tm=512, tf=512, cast_to_bf16=False,
                             force_tiled=False):
    """x: (batch, seq, d_model); w1: (d_ff, d_model); w2: (d_model, d_ff)."""
    batch, seq, d_model = x.shape
    d_ff = w1.shape[0]
    M = batch * seq

    out_dtype = x.dtype

    x2d = x.reshape(M, d_model)
    # Pre-transpose weights in the wrapper (free layout plumbing) so the
    # kernel never transposes a weight tile.
    w1t = w1.T  # (d_model, d_ff)
    w2t = w2.T  # (d_ff, d_model)

    if cast_to_bf16:
        # Opt-in: halves weight HBM traffic and runs the MXU at full bf16 rate.
        # Changes numerics vs the f32 reference, hence flag-gated.
        x2d = x2d.astype(jnp.bfloat16)
        w1t = w1t.astype(jnp.bfloat16)
        w2t = w2t.astype(jnp.bfloat16)

    in_isz = x2d.dtype.itemsize
    w_isz = w1t.dtype.itemsize
    out_isz = jnp.dtype(out_dtype).itemsize
    sub = max(_sublane(x2d.dtype), _sublane(out_dtype))

    # ---- row tiling -------------------------------------------------------
    tm_eff = min(max(tm, sub), _round_up(M, sub))
    tm_eff = _round_up(tm_eff, sub)
    # Keep >= 2 row tiles where possible so both v7x TensorCores get work.
    if -(-M // tm_eff) < 2:
        half = _round_up((tm_eff + 1) // 2, sub)
        if half < tm_eff and -(-M // half) >= 2:
            tm_eff = half

    # ---- d_ff padding: 256-aligned for the 2x256x256 MXU on v6e / v7x ------
    dff_pad = _round_up(d_ff, 256)

    # ---- choose resident-weights vs tiled-d_ff path -------------------------
    resident = (not force_tiled) and (
        _resident_vmem_bytes(tm_eff, d_model, dff_pad, in_isz, w_isz, out_isz)
        <= _VMEM_BUDGET
    )

    if resident:
        tf_eff = dff_pad
        need = _resident_vmem_bytes(tm_eff, d_model, dff_pad, in_isz, w_isz, out_isz)
    else:
        tf_eff = min(_round_up(max(tf, 256), 256), dff_pad)
        # Shrink tf, then tm, until the tiled working set fits the budget.
        while (_tiled_vmem_bytes(tm_eff, tf_eff, d_model, in_isz, w_isz, out_isz)
               > _VMEM_BUDGET and tf_eff > 256):
            tf_eff = max(256, _round_up(tf_eff // 2, 256))
        while (_tiled_vmem_bytes(tm_eff, tf_eff, d_model, in_isz, w_isz, out_isz)
               > _VMEM_BUDGET and tm_eff > 256):
            tm_eff = max(256, _round_up(tm_eff // 2, sub))
        dff_pad = _round_up(d_ff, tf_eff)
        need = _tiled_vmem_bytes(tm_eff, tf_eff, d_model, in_isz, w_isz, out_isz)

    m_pad = _round_up(M, tm_eff)
    n_row_tiles = m_pad // tm_eff

    # ---- pad operands (exact: GELU(0)=0 and padded W2^T rows are zero) -----
    if m_pad != M:
        x2d = jnp.pad(x2d, ((0, m_pad - M), (0, 0)))
    if dff_pad != d_ff:
        w1t = jnp.pad(w1t, ((0, 0), (0, dff_pad - d_ff)))
        w2t = jnp.pad(w2t, ((0, dff_pad - d_ff), (0, 0)))

    # ---- cost estimate (count weight re-streaming in the tiled path) -------
    weight_bytes = (w1t.size + w2t.size) * w_isz
    weight_streams = 1 if resident else n_row_tiles
    bytes_accessed = (
        x2d.size * in_isz
        + m_pad * d_model * out_isz
        + weight_streams * weight_bytes
    )
    cost = pl.CostEstimate(
        flops=4 * m_pad * d_model * dff_pad,
        transcendentals=m_pad * dff_pad,
        bytes_accessed=bytes_accessed,
    )

    # Explicit VMEM limit from the computed working set; capped at 64 MiB so
    # the same config is valid on v7x (64 MiB/TC) as well as v5e/v6e (128 MiB).
    vmem_limit = int(min(64 * 1024 * 1024, max(need * 3 // 2, 16 * 1024 * 1024)))

    if resident:
        out2d = pl.pallas_call(
            _ffn_kernel_resident,
            out_shape=jax.ShapeDtypeStruct((m_pad, d_model), out_dtype),
            grid_spec=pltpu.PrefetchScalarGridSpec(
                num_scalar_prefetch=0,
                grid=(n_row_tiles,),
                in_specs=[
                    pl.BlockSpec((tm_eff, d_model), lambda i: (i, 0)),
                    # Constant block index -> weights DMA'd from HBM exactly once.
                    pl.BlockSpec((d_model, dff_pad), lambda i: (0, 0)),
                    pl.BlockSpec((dff_pad, d_model), lambda i: (0, 0)),
                ],
                out_specs=pl.BlockSpec((tm_eff, d_model), lambda i: (i, 0)),
            ),
            compiler_params=pltpu.CompilerParams(
                dimension_semantics=("parallel",),
                vmem_limit_bytes=vmem_limit,
            ),
            cost_estimate=cost,
        )(x2d, w1t, w2t)
    else:
        out2d = pl.pallas_call(
            _ffn_kernel_tiled,
            out_shape=jax.ShapeDtypeStruct((m_pad, d_model), out_dtype),
            grid_spec=pltpu.PrefetchScalarGridSpec(
                num_scalar_prefetch=0,
                grid=(n_row_tiles, dff_pad // tf_eff),
                in_specs=[
                    pl.BlockSpec((tm_eff, d_model), lambda i, j: (i, 0)),
                    pl.BlockSpec((d_model, tf_eff), lambda i, j: (0, j)),
                    pl.BlockSpec((tf_eff, d_model), lambda i, j: (j, 0)),
                ],
                out_specs=pl.BlockSpec((tm_eff, d_model), lambda i, j: (i, 0)),
                scratch_shapes=[pltpu.VMEM((tm_eff, d_model), jnp.float32)],
            ),
            compiler_params=pltpu.CompilerParams(
                dimension_semantics=("parallel", "arbitrary"),
                vmem_limit_bytes=vmem_limit,
            ),
            cost_estimate=cost,
        )(x2d, w1t, w2t)

    if m_pad != M:
        out2d = out2d[:M]
    return out2d.reshape(batch, seq, d_model)


# ---------------------------------------------------------------------------
# Reference + demo
# ---------------------------------------------------------------------------
def _reference(x, w1, w2):
    h = jnp.einsum("bsd,fd->bsf", x, w1)
    g = h * 0.5 * (1.0 + lax.erf(h / jnp.sqrt(2.0)))
    return jnp.einsum("bsf,df->bsd", g, w2)


if __name__ == "__main__":
    key = jax.random.PRNGKey(0)
    kx, k1, k2, k3, k4 = jax.random.split(key, 5)

    # Test 1: small FFN, exercises the resident-weights (no-accumulator) path.
    batch, seq, d_model, d_ff = 2, 8, 32, 128
    x = jax.random.normal(kx, (batch, seq, d_model), dtype=jnp.float32)
    # nn.Linear(d_model, d_ff, bias=False).weight -> (d_ff, d_model)
    w1 = jax.random.normal(k1, (d_ff, d_model), dtype=jnp.float32) * (1.0 / jnp.sqrt(d_model))
    # nn.Linear(d_ff, d_model, bias=False).weight -> (d_model, d_ff)
    w2 = jax.random.normal(k2, (d_model, d_ff), dtype=jnp.float32) * (1.0 / jnp.sqrt(d_ff))

    out = jax.block_until_ready(positionwise_feedforward(x, w1, w2))
    ref = _reference(x, w1, w2)
    assert out.shape == (batch, seq, d_model)
    # Loose-ish tolerance: covers MXU reduced-precision f32 matmul passes.
    assert jnp.allclose(out, ref, atol=2e-2, rtol=2e-2), "mismatch (resident path)"

    # Test 2: force the tiled-d_ff fallback path (accumulator across j steps).
    d_ff2 = 512
    w1b = jax.random.normal(k3, (d_ff2, d_model), dtype=jnp.float32) * (1.0 / jnp.sqrt(d_model))
    w2b = jax.random.normal(k4, (d_model, d_ff2), dtype=jnp.float32) * (1.0 / jnp.sqrt(d_ff2))

    out2 = jax.block_until_ready(
        positionwise_feedforward(x, w1b, w2b, tf=256, force_tiled=True)
    )
    ref2 = _reference(x, w1b, w2b)
    assert out2.shape == (batch, seq, d_model)
    assert jnp.allclose(out2, ref2, atol=2e-2, rtol=2e-2), "mismatch (tiled path)"

    print("KERNEL_OK")
</pallas_src>

<mosaic_0001>
module attributes {stable_mosaic.version = 11 : i64} {
  func.func @_ffn_kernel_resident(%arg0: i32, %arg1: memref<8x32xf32, #tpu.memory_space<vmem>>, %arg2: memref<32x256xf32, #tpu.memory_space<vmem>>, %arg3: memref<256x32xf32, #tpu.memory_space<vmem>>, %arg4: memref<8x32xf32, #tpu.memory_space<vmem>>) attributes {dimension_semantics = [#tpu.dimension_semantics<parallel>], iteration_bounds = array<i64: 2>, scalar_prefetch = 0 : i64, scratch_operands = 0 : i64, tpu.core_type = #tpu.core_type<tc>, window_params = [{transform_indices = @transform_0, window_bounds = array<i64: 8, 32>}, {pipeline_mode = #tpu.pipeline_mode<synchronous>, transform_indices = @transform_1, window_bounds = array<i64: 32, 256>}, {pipeline_mode = #tpu.pipeline_mode<synchronous>, transform_indices = @transform_2, window_bounds = array<i64: 256, 32>}, {transform_indices = @transform_3, window_bounds = array<i64: 8, 32>}]} {
    %c0 = arith.constant 0 : index
    %c0_0 = arith.constant 0 : index
    %0 = vector.load %arg1[%c0, %c0_0] : memref<8x32xf32, #tpu.memory_space<vmem>>, vector<8x32xf32>
    %c0_1 = arith.constant 0 : index
    %c0_2 = arith.constant 0 : index
    %1 = vector.load %arg2[%c0_1, %c0_2] : memref<32x256xf32, #tpu.memory_space<vmem>>, vector<32x256xf32>
    %cst = arith.constant dense<0.000000e+00> : vector<8x256xf32>
    %2 = tpu.matmul %0, %1, %cst {dimension_numbers = #tpu.dot_dimension_numbers<[1], [0], [0], [1], [0, 0, 1, 1], [], []>} : vector<8x32xf32>, vector<32x256xf32>, vector<8x256xf32> -> vector<8x256xf32>
    %cst_3 = arith.constant 5.000000e-01 : f32
    %3 = vector.broadcast %cst_3 : f32 to vector<8x256xf32>
    %4 = arith.mulf %2, %3 : vector<8x256xf32>
    %cst_4 = arith.constant 0.707106769 : f32
    %5 = vector.broadcast %cst_4 : f32 to vector<8x256xf32>
    %6 = arith.mulf %2, %5 : vector<8x256xf32>
    %7 = math.erf %6 : vector<8x256xf32>
    %cst_5 = arith.constant 1.000000e+00 : f32
    %8 = vector.broadcast %cst_5 : f32 to vector<8x256xf32>
    %9 = arith.addf %8, %7 : vector<8x256xf32>
    %10 = arith.mulf %4, %9 : vector<8x256xf32>
    %c0_6 = arith.constant 0 : index
    %c0_7 = arith.constant 0 : index
    %11 = vector.load %arg3[%c0_6, %c0_7] : memref<256x32xf32, #tpu.memory_space<vmem>>, vector<256x32xf32>
    %cst_8 = arith.constant dense<0.000000e+00> : vector<8x32xf32>
    %12 = tpu.matmul %10, %11, %cst_8 {dimension_numbers = #tpu.dot_dimension_numbers<[1], [0], [0], [1], [0, 0, 1, 1], [], []>} : vector<8x256xf32>, vector<256x32xf32>, vector<8x32xf32> -> vector<8x32xf32>
    %c0_9 = arith.constant 0 : index
    %c0_10 = arith.constant 0 : index
    %13 = vector.load %arg4[%c0_9, %c0_10] : memref<8x32xf32, #tpu.memory_space<vmem>>, vector<8x32xf32>
    tpu.vector_store %arg4[%c0_9, %c0_10], %12 {strides = array<i32>} : memref<8x32xf32, #tpu.memory_space<vmem>>, vector<8x32xf32>,
    return
  }
  func.func @transform_0(%arg0: i32) -> (i32, i32) {
    %c0_i32 = arith.constant 0 : i32
    %c0_i32_0 = arith.constant 0 : i32
    return %arg0, %c0_i32 : i32, i32
  }
  func.func @transform_1(%arg0: i32) -> (i32, i32) {
    %c0_i32 = arith.constant 0 : i32
    %c0_i32_0 = arith.constant 0 : i32
    %c0_i32_1 = arith.constant 0 : i32
    return %c0_i32, %c0_i32_0 : i32, i32
  }
  func.func @transform_2(%arg0: i32) -> (i32, i32) {
    %c0_i32 = arith.constant 0 : i32
    %c0_i32_0 = arith.constant 0 : i32
    %c0_i32_1 = arith.constant 0 : i32
    return %c0_i32, %c0_i32_0 : i32, i32
  }
  func.func @transform_3(%arg0: i32) -> (i32, i32) {
    %c0_i32 = arith.constant 0 : i32
    %c0_i32_0 = arith.constant 0 : i32
    return %arg0, %c0_i32 : i32, i32
  }
}

</mosaic_0001>

<bundles_post_ra>
// kernel: positionwise_feedforward.1
= control target key start
LH: loop header
LB: loop body
LE: loop exit
PB: predicated region body
PF: predicated region fallthrough
CT: control target
= control target key end

     0   :  { %8 = vsyncpa [#allocation3], 0  ;;  %s874_s0 = inlined_call_operand.vmem [shape: f32[16,32], index: 0, kind: input, shape index: {}]   ;;  %s875_s1 = inlined_call_operand.vmem [shape: f32[32,256], index: 1, kind: input, shape index: {}]   ;;  %s876_s2 = inlined_call_operand.vmem [shape: f32[256,32], index: 2, kind: input, shape index: {}]   ;;  %s877_s3 = inlined_call_operand.hbm [shape: f32[16,32], index: 3, kind: output, shape index: {}]  }
   0x1   :  { %10 = vsyncpa [#allocation3 + $0x1], 0  ;;  %s652_s12 = smov 0   ;;  %s654_s13 = smov 0  }
   0x2   :  { %s656_s14 = smov 0   ;;  %s658_s15 = smov 0  }
   0x3 LB: > { %s673_s16 = sadd.s32 4294967295, %s628_s15   ;;  %s436_s17 = sadd.s32 4294967294, %s628_s15   ;;  %s628_s15 = sphi %s658_s15, %s883_s15   ;;  %s624_s14 = sphi %s656_s14, %s882_s14   ;;  %s620_s13 = sphi %s654_s13, %s881_s13   ;;  %s616_s12 = sphi %s652_s12, %s880_s12  }
   0x4   : > { %s677_s18 = sadd.s32 1, %s628_s15   ;;  %s91_s19 = sadd.s32 1, %s624_s14 }
   0x5   : > { %s88_s20 = ssub.s32 %s628_s15, %s677_s18  ;;  %p101_p0 = scmp.ne.s32.totalorder %s624_s14, %s620_s13 }
   0x6   : > { %p89_p1 = scmp.eq.s32.totalorder %s88_s20, 0  ;;  %p102_p2 = scmp.eq.s32.totalorder %s673_s16, 1 }
   0x7   : > { %p107_p3 = scmp.ne.s32.totalorder %s620_s13, %s616_s12  ;;  %p108_p4 = scmp.eq.s32.totalorder %s436_s17, 1 }
   0x8   : > { %s688_s21 = scalar_select %p89_p1, %s624_s14, %s91_s19  }
   0x9   : > { %p690_p5 = por %p102_p2, %p101_p0  ;;  %p694_p6 = por %p108_p4, %p107_p3 }
   0xa   : > { %p439_p7 = scmp.ge.s32.totalorder %s628_s15, 1  ;;  %p139_p8 = scmp.lt.s32.totalorder %s628_s15, 3 }
   0xc   : > { %p140_p9 = pnand %p439_p7, %p139_p8 }
   0xd   : > { %v168_v0 = vld [vmem:[%s875_s1 + $0x8] sm:$0xff] (!%p140_p9)  ;;  %v170_v1 = vld [vmem:[%s875_s1 + $0x18] sm:$0xff] (!%p140_p9)  ;;  %v167_v2 = vld [vmem:[%s875_s1] sm:$0xff] (!%p140_p9)  ;;  %p162_p10 = scmp.lt.s32.totalorder (!%p140_p9), %s673_s16, 1  ;;  %v630_v7 = vmov (!%p140_p9), 0.0   ;;  %vm175_vm0 = vcmask (!%p140_p9), 261120  }
   0xe   : > { %143 = sbr.rel (%p140_p9) target bundleno = 486 (0x1e6), region = 32  ;;  %v482_v3 = vpack.c.bf16 (!%p140_p9), %v170_v1, %v168_v0  ;;  %v169_v4 = vld [vmem:[%s875_s1 + $0x10] sm:$0xff] (!%p140_p9)  ;;  %v172_v5 = vld [vmem:[%s875_s1 + $0x28] sm:$0xff] (!%p140_p9)  ;;  %v174_v6 = vld [vmem:[%s875_s1 + $0x38] sm:$0xff] (!%p140_p9)  ;;  %243 = vmatprep.mubr.f32.mxu0 (!%p140_p9), %v630_v7  ;;  %s159_s10 = sand.u32 (!%p140_p9), 1, %s620_s13  }
   0xf   : > { %v484_v8 = vpack.c.bf16 (!%p140_p9), %v169_v4, %v167_v2  ;;  %v486_v9 = vpack.c.bf16 (!%p140_p9), %v174_v6, %v172_v5  ;;  %v171_v10 = vld [vmem:[%s875_s1 + $0x20] sm:$0xff] (!%p140_p9)  ;;  %v173_v11 = vld [vmem:[%s875_s1 + $0x30] sm:$0xff] (!%p140_p9)  ;;  %v277_v13 = vld [vmem:[%s876_s2 + $0x88] sm:$0xff] (!%p140_p9)  ;;  %s440_s11 = sshll.u32 (!%p140_p9), %s159_s10, 3  ;;  %s444_s17 = sshll.u32 (!%p140_p9), %s673_s16, 7 }
  0x10   : > { %v276_v12 = vld [vmem:[%s876_s2 + $0x80] sm:$0xff] (!%p140_p9)  ;;  %483 = vmatprep.subr.bf16.mxu0 (!%p140_p9), %v482_v3  ;;  %v261_v15 = vld [vmem:[%s876_s2 + $0x8] sm:$0xff] (!%p140_p9)  ;;  %v488_v16 = vpack.c.bf16 (!%p140_p9), %v173_v11, %v171_v10  ;;  %v278_v19 = vld [vmem:[%s876_s2 + $0x90] sm:$0xff] (!%p140_p9)  ;;  %s831_s26 = scalar_lea.hbm (!%p140_p9), %s877_s3, %s444_s17  ;;  %s364_s27 = scalar_lea.sflag (!%p140_p9), [#allocation3], %s159_s10 }
  0x11   : > { %v260_v14 = vld [vmem:[%s876_s2] sm:$0xff] (!%p140_p9)  ;;  %485 = vmatpush1.bf16.msra.mxu0 (!%p140_p9), %v484_v8  ;;  %v490_v17 = vpack.c.bf16 (!%p140_p9), %v277_v13, %v276_v12  ;;  %v279_v20 = vld [vmem:[%s876_s2 + $0x98] sm:$0xff] (!%p140_p9)  ;;  %v262_v21 = vld [vmem:[%s876_s2 + $0x10] sm:$0xff] (!%p140_p9) }
  0x12   : > { %v492_v18 = vpack.c.bf16 (!%p140_p9), %v261_v15, %v260_v14  ;;  %487 = vmatprep.subr.bf16.mxu0 (!%p140_p9), %v486_v9  ;;  %v494_v22 = vpack.c.bf16 (!%p140_p9), %v279_v20, %v278_v19  ;;  %v263_v23 = vld [vmem:[%s876_s2 + $0x18] sm:$0xff] (!%p140_p9)  ;;  %v280_v24 = vld [vmem:[%s876_s2 + $0xa0] sm:$0xff] (!%p140_p9)  ;;  %v281_v25 = vld [vmem:[%s876_s2 + $0xa8] sm:$0xff] (!%p140_p9) }
  0x13   : > { %491 = vmatprep.subr.bf16.mxu1 (!%p140_p9), %v490_v17  ;;  %v496_v26 = vpack.c.bf16 (!%p140_p9), %v263_v23, %v262_v21  ;;  %v498_v28 = vpack.c.bf16 (!%p140_p9), %v281_v25, %v280_v24  ;;  %v264_v29 = vld [vmem:[%s876_s2 + $0x20] sm:$0xff] (!%p140_p9)  ;;  %v265_v30 = vld [vmem:[%s876_s2 + $0x28] sm:$0xff] (!%p140_p9)  ;;  %v282_v32 = vld [vmem:[%s876_s2 + $0xb0] sm:$0xff] (!%p140_p9) }
  0x14   : > { %493 = vmatpush3.bf16.msra.mxu1 (!%p140_p9), %v492_v18  ;;  %v500_v31 = vpack.c.bf16 (!%p140_p9), %v265_v30, %v264_v29  ;;  %v283_v33 = vld [vmem:[%s876_s2 + $0xb8] sm:$0xff] (!%p140_p9)  ;;  %v266_v35 = vld [vmem:[%s876_s2 + $0x30] sm:$0xff] (!%p140_p9)  ;;  %v284_v38 = vld [vmem:[%s876_s2 + $0xc0] sm:$0xff] (!%p140_p9) }
  0x15   : > { %s163_s19 = scalar_select %p162_p10, %s673_s16, 1  ;;  %489 = vmatpush1.bf16.msra.mxu0 %v488_v16  ;;  %495 = vmatprep.subr.bf16.mxu1 %v494_v22  ;;  %v502_v34 = vpack.c.bf16 %v283_v33, %v282_v32  ;;  %v267_v36 = vld [vmem:[%s876_s2 + $0x38] sm:$0xff]  ;;  %v285_v39 = vld [vmem:[%s876_s2 + $0xc8] sm:$0xff]  ;;  %v268_v41 = vld [vmem:[%s876_s2 + $0x40] sm:$0xff] }
  0x16   : > { %v504_v37 = vpack.c.bf16 %v267_v36, %v266_v35  ;;  %v506_v40 = vpack.c.bf16 %v285_v39, %v284_v38  ;;  %v269_v42 = vld [vmem:[%s876_s2 + $0x48] sm:$0xff]  ;;  %v286_v44 = vld [vmem:[%s876_s2 + $0xd0] sm:$0xff]  ;;  %v287_v45 = vld [vmem:[%s876_s2 + $0xd8] sm:$0xff]  ;;  %s631_s16 = smov [#allocation2]  }
  0x17   : > { %s441_s4 = sshll.u32 %s163_s19, 3  ;;  %v508_v43 = vpack.c.bf16 %v269_v42, %v268_v41  ;;  %v510_v46 = vpack.c.bf16 %v287_v45, %v286_v44  ;;  %v270_v47 = vld [vmem:[%s876_s2 + $0x50] sm:$0xff]  ;;  %v271_v48 = vld [vmem:[%s876_s2 + $0x58] sm:$0xff]  ;;  %v288_v50 = vld [vmem:[%s876_s2 + $0xe0] sm:$0xff]  ;;  %s570_s29 = sshll.u32 %s631_s16, 4  ;;  %s571_s29 = int_to_ptr.vmem [resolvable:$false] %s570_s29 }
  0x18   : > { %s165_s20 = scalar_lea.vmem %s874_s0, %s441_s4  ;;  %497 = vmatpush3.bf16.msra.mxu1 %v496_v26  ;;  %v512_v49 = vpack.c.bf16 %v271_v48, %v270_v47  ;;  %v289_v51 = vld [vmem:[%s876_s2 + $0xe8] sm:$0xff]  ;;  %v272_v53 = vld [vmem:[%s876_s2 + $0x60] sm:$0xff]  ;;  %v290_v56 = vld [vmem:[%s876_s2 + $0xf0] sm:$0xff]  ;;  %s572_s30 = scalar_lea.vmem %s571_s29, 256 }
  0x19   : > { %v166_v27 = vld [vmem:[%s165_s20] sm:$0xff]  ;;  %499 = vmatprep.subr.bf16.mxu1 %v498_v28  ;;  %v514_v52 = vpack.c.bf16 %v289_v51, %v288_v50  ;;  %v273_v54 = vld [vmem:[%s876_s2 + $0x68] sm:$0xff]  ;;  %v291_v57 = vld [vmem:[%s876_s2 + $0xf8] sm:$0xff]  ;;  %s161_s20 = scalar_lea.vmem [#allocation2], %s440_s11 }
  0x1a   : > { %442 = vmatmul.mubr.msk.f32.vlgmr.msra.gmra.mrb[0].mxu0 %vm175_vm0, %v166_v27  ;;  %v516_v55 = vpack.c.bf16 %v273_v54, %v272_v53  ;;  %v518_v58 = vpack.c.bf16 %v291_v57, %v290_v56  ;;  %v274_v59 = vld [vmem:[%s876_s2 + $0x70] sm:$0xff]  ;;  %v275_v60 = vld [vmem:[%s876_s2 + $0x78] sm:$0xff]  ;;  %s377_s19 = sshll.u32 %s161_s20, 4  ;;  %s833_s19 = int_to_ptr.vmem [resolvable:$true] %s377_s19 }
  0x1b   : > { %v520_v61 = vpack.c.bf16 %v275_v60, %v274_v59  ;;  %s566_s28 = scalar_lea.vmem %s833_s19, 128  ;;  %p573_p0 = scmp.lt.s32.totalorder %s833_s19, %s571_s29 }
  0x1c   : > { %501 = vmatpush3.bf16.msra.mxu1 %v500_v31  ;;  %p567_p11 = scmp.ne.s32.totalorder %s833_s19, %s566_s28  ;;  %p574_p1 = scmp.lt.s32.totalorder %s572_s30, %s566_s28 }
  0x1d   : > { %503 = vmatprep.subr.bf16.mxu1 %v502_v34 }
  0x1e   : > { %p568_p12 = pnand %p567_p11, %p690_p5  ;;  %p575_p2 = por %p574_p1, %p573_p0 }
  0x20   : > { %505 = vmatpush3.bf16.msra.mxu1 %v504_v37  ;;  %p569_p13 = pneg %p568_p12 }
  0x21   : > { %507 = vmatprep.subr.bf16.mxu1 %v506_v40 }
  0x22   : > { %p576_p3 = pnand %p575_p2, %p569_p13 }
  0x24   : > { %509 = vmatpush3.bf16.msra.mxu1 %v508_v43 }
  0x25   : > { %511 = vmatprep.subr.bf16.mxu1 %v510_v46 }
  0x28   : > { %513 = vmatpush3.bf16.msra.mxu1 %v512_v49 }
  0x29   : > { %515 = vmatprep.subr.bf16.mxu1 %v514_v52 }
  0x2c   : > { %517 = vmatpush3.bf16.msra.mxu1 %v516_v55 }
  0x2d   : > { %519 = vmatprep.subr.bf16.mxu1 %v518_v58 }
  0x30   : > { %521 = vmatpush3.bf16.msra.mxu1 %v520_v61 }
  0xed   : > { %v245_v62 = vpop.f32.mrb[0].mxu0 }
  0xee   : > { %v252_v63 = vmul.f32 0.70710677, %v245_v62  ;;  %v247_v0 = vpop.f32.mrb[1].mxu0  ;;  %v250_v7 = vmul.f32 0.5, %v245_v62 }
  0xef   : > { %v253_v1 = vmul.f32 0.70710677, %v247_v0  ;;  %v251_v5 = vmul.f32 0.5, %v247_v0 }
  0xf0   : > { %562 = verf.f32 %v252_v63 }
  0xf1   : > { %564 = verf.f32 %v253_v1 }
  0xfa   : > { %v563_v2 = vpop.eup %562 }
  0xfb   : > { %v565_v3 = vpop.eup %564  ;;  %v256_v4 = vadd.f32 1.0, %v563_v2 }
  0xfc   : > { %v257_v6 = vadd.f32 1.0, %v565_v3 }
  0xfd   : > { %v258_v9 = vmul.f32 %v256_v4, %v250_v7 }
  0xfe   : > { %v259_v8 = vmul.f32 %v257_v6, %v251_v5 }
 0x100   : > { %356 = vmatprep.mubr.f32.mxu1 %v259_v8 }
 0x101   : > { %357 = vmatmul.mubr.f32.vlgmr.msra.gmra.mrb[0].mxu1 %v258_v9 }
 0x1d4   : > { %v479_v10 = vpop.f32.mrb[0].mxu1 }
 0x1d5   : > { %v480_v11 = vpop.f32.mrb[1].mxu1 }
 0x1d6   : > { %v481_v12 = vadd.f32 %v480_v11, %v479_v10 }
 0x1d8   : > { %362 = vst.msk [vmem:[%s161_s20] sm:$0xff] %vm175_vm0, %v481_v12 }
 0x1d9   : > { %579 = shalt.err (!%p576_p3)
}
 0x1da   : > { %s580_s4 = scalar_lea.hbm %s831_s26, 128  ;;  %s584_s7 = scalar_lea.hbm %s877_s3, 256 }
 0x1db   : > { %p581_p4 = scmp.ne.s32.totalorder %s831_s26, %s580_s4  ;;  %p585_p9 = scmp.lt.u32.totalorder %s831_s26, %s877_s3 }
 0x1dc   : > { %p586_p10 = scmp.lt.u32.totalorder %s584_s7, %s580_s4  ;;  %p588_p12 = scmp.lt.u32.totalorder %s580_s4, %s831_s26 }
 0x1dd   : > { %p582_p7 = pnand %p581_p4, %p690_p5 }
 0x1de   : > { %p587_p11 = por %p586_p10, %p585_p9 }
 0x1df   : > { %p583_p8 = pneg %p582_p7 }
 0x1e0   : > { %p589_p13 = por %p588_p12, %p587_p11 }
 0x1e2   : > { %p590_p0 = pnand %p589_p13, %p583_p8 }
 0x1e4   : > { %593 = shalt.err (!%p590_p0)
}
 0x1e5   : > { %522 = dma.vmem_to_hbm [thread:$0]  (%p690_p5), %s833_s19, 128, %s831_s26, %s364_s27  }
 0x1e6 PF: > { %p528_p1 = scmp.ge.s32.totalorder %s628_s15, 2  ;;  %s389_s10 = sand.u32 1, %s616_s12  }
 0x1e7   : > { %s390_s11 = scalar_lea.sflag [#allocation3], %s389_s10 }
 0x1e8   : > { %p525_p2 = pnand %p528_p1, %p694_p6 }
 0x1ea   : > { %611 = dma.done.wait (!%p525_p2), %s390_s11, 128  }
 0x1eb   : > { %613 = vsyncadd (!%p525_p2), %s390_s11, 4294967168  ;;  %p13_p3 = scmp.ge.s32.totalorder %s677_s18, 4   ;;  %s880_s12 = smov %s620_s13 }
 0x1ec   : > { %s881_s13 = smov %s624_s14  ;;  %s882_s14 = smov %s688_s21 }
 0x1ed   : > { %s883_s15 = smov %s677_s18  ;;  %15 = sbr.rel (!%p13_p3) target bundleno = 3 (0x3), region = 67 }
 0x1f4   :  { %395 = vsyncpa [#allocation3], 1 }
 0x1f5   :  { %397 = vsyncpa [#allocation3 + $0x1], 1 }

</bundles_post_ra>
